<compile_context>
chip_gen: v6e
topology: v6e:2x2x1
jax: 0.10.0
libtpu: 0.0.40
codegen_flags: <defaults>
</compile_context>

<pallas_src>
import functools

import jax
import jax.numpy as jnp
from jax.experimental import pallas as pl
from jax.experimental.pallas import tpu as pltpu


# ---------------------------------------------------------------------------
# Pass A: streamed spatial reduction (deferred cross-lane reduce) + tiny
#         FC -> ReLU -> FC -> sigmoid in the finalize step of the last tile.
#         The (b_tile, C, fold) VMEM scratch is the running accumulator; the
#         (b_tile, C, 1) output block is written once, in finalize.
# ---------------------------------------------------------------------------
def _se_reduce_kernel(x_ref, w1_ref, w2_ref, gate_ref, part_ref, *,
                      hw, lane_tile, fold, nfold, needs_mask):
    j = pl.program_id(1)  # spatial-tile index (innermost, reduction axis)

    @pl.when(j == 0)
    def _init():
        part_ref[...] = jnp.zeros_like(part_ref)

    x = x_ref[...].astype(jnp.float32)                        # (b_t, C, lane_tile)
    if needs_mask:
        # Last spatial tile is partial: OOB lane contents are undefined.
        lane = jax.lax.broadcasted_iota(jnp.int32, x.shape, 2) + j * lane_tile
        x = jnp.where(lane < hw, x, 0.0)

    # Fold lane_tile lanes down to `fold` lanes with elementwise VPU adds; the
    # expensive cross-lane (XLU) reduction happens once, in finalize.
    acc = x[:, :, 0:fold]
    for t in range(1, nfold):
        acc = acc + x[:, :, t * fold:(t + 1) * fold]
    part_ref[...] += acc

    @pl.when(j == pl.num_programs(1) - 1)
    def _finalize():
        y = jnp.sum(part_ref[...], axis=-1) * (1.0 / hw)       # (b_t, C) true mean
        h = jnp.dot(y, w1_ref[...], preferred_element_type=jnp.float32)
        h = jnp.maximum(h, 0.0)                                # (b_t, C//r)
        s = jnp.dot(h, w2_ref[...], preferred_element_type=jnp.float32)
        s = jax.nn.sigmoid(s)                                  # (b_t, C)
        gate_ref[...] = s[:, :, None]                          # (b_t, C, 1)


# ---------------------------------------------------------------------------
# Pass B: pure streaming channel scale.  No masks needed: OOB output lanes /
#         rows of a partial block are discarded on store.
# ---------------------------------------------------------------------------
def _se_scale_kernel(x_ref, gate_ref, o_ref):
    x = x_ref[...]
    s = gate_ref[...].astype(x.dtype)            # (b_t, C, 1) -> lane broadcast
    o_ref[...] = (x * s).astype(o_ref.dtype)


def _vmem_limit_bytes():
    cap = 64 << 20  # conservative fallback (v7x physical VMEM)
    try:
        info = pltpu.get_tpu_info()
        cap = int(getattr(info, "vmem_capacity_bytes", cap))
    except Exception:
        pass
    # ~3/4 of physical VMEM: 48 MiB on v7x, 96 MiB on v5e/v6e.
    return min((cap * 3) // 4, 112 << 20)


def _choose_tiles(B, C, HW, itemsize, budget):
    # Largest lane tile (for a single batch row) under the block-byte budget.
    max_lane = max(128, ((budget // max(1, C * itemsize)) // 128) * 128)
    if HW <= max_lane:
        lane_tile = HW          # full spatial dim: full-array-dim exception, no mask
    else:
        lane_tile = max_lane    # multiple of 128; partial last tile masked in-kernel
    n_hw = pl.cdiv(HW, lane_tile)

    # Batch tile: fill the budget, but keep >= 2 batch blocks when B >= 2 so
    # both TensorCores (v7x megacore) get work on the reduce pass.
    b_fit = max(1, budget // max(1, C * lane_tile * itemsize))
    meg_cap = pl.cdiv(B, 2) if B > 1 else 1
    b_tile = max(1, min(B, b_fit, meg_cap))
    n_b = pl.cdiv(B, b_tile)
    return lane_tile, n_hw, b_tile, n_b


def squeeze_excitation(x, w1, w2, *, block_budget_bytes=None):
    """SqueezeExcitation forward.

    x: (B, C, H, W); w1: (C, C//r); w2: (C//r, C)  (both Linear layers bias=False;
    weights stored as (in, out) = transpose of PyTorch's Linear weight).
    Returns x * sigmoid(relu(mean(x) @ w1) @ w2) broadcast over H, W.
    """
    B, C, H, W = x.shape
    Cr = w1.shape[1]
    HW = H * W

    vmem_limit = _vmem_limit_bytes()
    budget = block_budget_bytes or min(8 << 20, vmem_limit // 6)
    lane_tile, n_hw, b_tile, n_b = _choose_tiles(B, C, HW, x.dtype.itemsize, budget)

    if lane_tile % 128 == 0:
        fold, nfold = 128, lane_tile // 128
    else:
        fold, nfold = lane_tile, 1            # only happens when n_hw == 1
    needs_mask = (HW % lane_tile) != 0

    x_flat = x.reshape(B, C, HW)              # no pad, no extra copy

    # ---- Pass A: per-(B, C) mean -> FC -> ReLU -> FC -> sigmoid gates -------
    reduce_cost = pl.CostEstimate(
        flops=int(B * C * HW + 4 * B * C * Cr),
        transcendentals=int(B * C),
        bytes_accessed=int(x_flat.size * x.dtype.itemsize
                           + (w1.size + w2.size + B * C) * 4),
    )
    gate = pl.pallas_call(
        functools.partial(_se_reduce_kernel, hw=HW, lane_tile=lane_tile,
                          fold=fold, nfold=nfold, needs_mask=needs_mask),
        out_shape=jax.ShapeDtypeStruct((B, C, 1), jnp.float32),
        grid=(n_b, n_hw),
        in_specs=[
            pl.BlockSpec((b_tile, C, lane_tile), lambda b, j: (b, 0, j)),
            pl.BlockSpec((C, Cr), lambda b, j: (0, 0)),
            pl.BlockSpec((Cr, C), lambda b, j: (0, 0)),
        ],
        # Same output block across the spatial axis -> written once in finalize.
        out_specs=pl.BlockSpec((b_tile, C, 1), lambda b, j: (b, 0, 0)),
        scratch_shapes=[pltpu.VMEM((b_tile, C, fold), jnp.float32)],
        compiler_params=pltpu.CompilerParams(
            dimension_semantics=("parallel", "arbitrary"),
            vmem_limit_bytes=vmem_limit,
        ),
        cost_estimate=reduce_cost,
    )(x_flat, w1, w2)

    # ---- Pass B: streaming channel scale ------------------------------------
    scale_cost = pl.CostEstimate(
        flops=int(B * C * HW),
        transcendentals=0,
        bytes_accessed=int(2 * x_flat.size * x.dtype.itemsize + B * C * 4),
    )
    out_flat = pl.pallas_call(
        _se_scale_kernel,
        out_shape=jax.ShapeDtypeStruct((B, C, HW), x.dtype),
        grid=(n_b, n_hw),
        in_specs=[
            pl.BlockSpec((b_tile, C, lane_tile), lambda b, j: (b, 0, j)),
            pl.BlockSpec((b_tile, C, 1), lambda b, j: (b, 0, 0)),
        ],
        out_specs=pl.BlockSpec((b_tile, C, lane_tile), lambda b, j: (b, 0, j)),
        compiler_params=pltpu.CompilerParams(
            dimension_semantics=("parallel", "parallel"),
            vmem_limit_bytes=vmem_limit,
        ),
        cost_estimate=scale_cost,
    )(x_flat, gate)

    return out_flat.reshape(B, C, H, W)
    # TODO(synk): single-read variant (cache x tiles in a persistent VMEM slab
    # during Pass A and scale from the slab) for activations that fit VMEM.


def _reference(x, w1, w2):
    # pure-JAX reference mirroring the PyTorch forward (Linear layers bias=False)
    y = jnp.mean(x, axis=(2, 3))                 # (B, C)
    h = jnp.maximum(y @ w1, 0.0)                 # (B, C//r)
    s = jax.nn.sigmoid(h @ w2)                   # (B, C)
    return x * s[:, :, None, None]


if __name__ == "__main__":
    key = jax.random.PRNGKey(0)
    kx1, kx2, kx3, k1, k2 = jax.random.split(key, 5)

    B, C, reduction = 2, 32, 16
    Cr = C // reduction

    # deterministic "Kaiming-ish" init, stored as (in, out) for the kernel
    w1 = jax.random.normal(k1, (C, Cr), dtype=jnp.float32) * (1.0 / jnp.sqrt(C))
    w2 = jax.random.normal(k2, (Cr, C), dtype=jnp.float32) * (1.0 / jnp.sqrt(Cr))

    def check(x, **kw):
        out = jax.block_until_ready(squeeze_excitation(x, w1, w2, **kw))
        ref = _reference(x, w1, w2)
        assert out.shape == x.shape
        assert jnp.allclose(out, ref, atol=1e-5, rtol=1e-5), "mismatch vs reference"

    # Case 1: HW = 1024 -> single full-dim lane tile, deferred-fold reduce.
    check(jax.random.normal(kx1, (B, C, 32, 32), dtype=jnp.float32))

    # Case 2: HW = 49 (realistic SE size < 128) -> full-dim lane tile, no padding.
    check(jax.random.normal(kx2, (B, C, 7, 7), dtype=jnp.float32))

    # Case 3: HW = 400 with a tiny block budget -> multi-tile spatial reduction
    # with a masked partial last tile (exercises the no-pad masking path).
    check(jax.random.normal(kx3, (B, C, 20, 20), dtype=jnp.float32),
          block_budget_bytes=32 * 1024)

    print("KERNEL_OK")
</pallas_src>

<mosaic_0001>
module attributes {stable_mosaic.version = 11 : i64} {
  func.func @_se_reduce_kernel(%arg0: i32, %arg1: i32, %arg2: memref<1x32x1024xf32, #tpu.memory_space<vmem>>, %arg3: memref<32x2xf32, #tpu.memory_space<vmem>>, %arg4: memref<2x32xf32, #tpu.memory_space<vmem>>, %arg5: memref<1x32x1xf32, #tpu.memory_space<vmem>>, %arg6: memref<1x32x128xf32, #tpu.memory_space<vmem>>) attributes {dimension_semantics = [#tpu.dimension_semantics<parallel>, #tpu.dimension_semantics<arbitrary>], iteration_bounds = array<i64: 2, 1>, scalar_prefetch = 0 : i64, scratch_operands = 1 : i64, tpu.core_type = #tpu.core_type<tc>, window_params = [{transform_indices = @transform_0, window_bounds = array<i64: 1, 32, 1024>}, {pipeline_mode = #tpu.pipeline_mode<synchronous>, transform_indices = @transform_1, window_bounds = array<i64: 32, 2>}, {pipeline_mode = #tpu.pipeline_mode<synchronous>, transform_indices = @transform_2, window_bounds = array<i64: 2, 32>}, {transform_indices = @transform_3, window_bounds = array<i64: 1, 32, 1>}]} {
    %c0_i32 = arith.constant 0 : i32
    %0 = arith.cmpi eq, %arg1, %c0_i32 : i32
    %1 = arith.extui %0 : i1 to i32
    %c0_i32_0 = arith.constant 0 : i32
    %2 = arith.cmpi ne, %1, %c0_i32_0 : i32
    scf.if %2 {
      %cst = arith.constant 0.000000e+00 : f32
      %25 = vector.broadcast %cst : f32 to vector<1x32x128xf32>
      %c0_11 = arith.constant 0 : index
      %c0_12 = arith.constant 0 : index
      %c0_13 = arith.constant 0 : index
      %26 = vector.load %arg6[%c0_11, %c0_12, %c0_13] : memref<1x32x128xf32, #tpu.memory_space<vmem>>, vector<1x32x128xf32>
      tpu.vector_store %arg6[%c0_11, %c0_12, %c0_13], %25 {strides = array<i32>} : memref<1x32x128xf32, #tpu.memory_space<vmem>>, vector<1x32x128xf32>,
    } else {
    }
    %c0 = arith.constant 0 : index
    %c0_1 = arith.constant 0 : index
    %c0_2 = arith.constant 0 : index
    %3 = vector.load %arg2[%c0, %c0_1, %c0_2] : memref<1x32x1024xf32, #tpu.memory_space<vmem>>, vector<1x32x1024xf32>
    %4 = vector.extract_strided_slice %3 {offsets = [0, 0, 0], sizes = [1, 32, 128], strides = [1, 1, 1]} : vector<1x32x1024xf32> to vector<1x32x128xf32>
    %5 = vector.extract_strided_slice %3 {offsets = [0, 0, 128], sizes = [1, 32, 128], strides = [1, 1, 1]} : vector<1x32x1024xf32> to vector<1x32x128xf32>
    %6 = arith.addf %4, %5 : vector<1x32x128xf32>
    %7 = vector.extract_strided_slice %3 {offsets = [0, 0, 256], sizes = [1, 32, 128], strides = [1, 1, 1]} : vector<1x32x1024xf32> to vector<1x32x128xf32>
    %8 = arith.addf %6, %7 : vector<1x32x128xf32>
    %9 = vector.extract_strided_slice %3 {offsets = [0, 0, 384], sizes = [1, 32, 128], strides = [1, 1, 1]} : vector<1x32x1024xf32> to vector<1x32x128xf32>
    %10 = arith.addf %8, %9 : vector<1x32x128xf32>
    %11 = vector.extract_strided_slice %3 {offsets = [0, 0, 512], sizes = [1, 32, 128], strides = [1, 1, 1]} : vector<1x32x1024xf32> to vector<1x32x128xf32>
    %12 = arith.addf %10, %11 : vector<1x32x128xf32>
    %13 = vector.extract_strided_slice %3 {offsets = [0, 0, 640], sizes = [1, 32, 128], strides = [1, 1, 1]} : vector<1x32x1024xf32> to vector<1x32x128xf32>
    %14 = arith.addf %12, %13 : vector<1x32x128xf32>
    %15 = vector.extract_strided_slice %3 {offsets = [0, 0, 768], sizes = [1, 32, 128], strides = [1, 1, 1]} : vector<1x32x1024xf32> to vector<1x32x128xf32>
    %16 = arith.addf %14, %15 : vector<1x32x128xf32>
    %17 = vector.extract_strided_slice %3 {offsets = [0, 0, 896], sizes = [1, 32, 128], strides = [1, 1, 1]} : vector<1x32x1024xf32> to vector<1x32x128xf32>
    %18 = arith.addf %16, %17 : vector<1x32x128xf32>
    %c0_3 = arith.constant 0 : index
    %c0_4 = arith.constant 0 : index
    %c0_5 = arith.constant 0 : index
    %19 = vector.load %arg6[%c0_3, %c0_4, %c0_5] : memref<1x32x128xf32, #tpu.memory_space<vmem>>, vector<1x32x128xf32>
    %20 = arith.addf %19, %18 : vector<1x32x128xf32>
    %c0_6 = arith.constant 0 : index
    %c0_7 = arith.constant 0 : index
    %c0_8 = arith.constant 0 : index
    %21 = vector.load %arg6[%c0_6, %c0_7, %c0_8] : memref<1x32x128xf32, #tpu.memory_space<vmem>>, vector<1x32x128xf32>
    tpu.vector_store %arg6[%c0_6, %c0_7, %c0_8], %20 {strides = array<i32>} : memref<1x32x128xf32, #tpu.memory_space<vmem>>, vector<1x32x128xf32>,
    %c0_i32_9 = arith.constant 0 : i32
    %22 = arith.cmpi eq, %arg1, %c0_i32_9 : i32
    %23 = arith.extui %22 : i1 to i32
    %c0_i32_10 = arith.constant 0 : i32
    %24 = arith.cmpi ne, %23, %c0_i32_10 : i32
    scf.if %24 {
      %c0_11 = arith.constant 0 : index
      %c0_12 = arith.constant 0 : index
      %c0_13 = arith.constant 0 : index
      %25 = vector.load %arg6[%c0_11, %c0_12, %c0_13] : memref<1x32x128xf32, #tpu.memory_space<vmem>>, vector<1x32x128xf32>
      %cst = arith.constant dense<0.000000e+00> : vector<1x32xf32>
      %26 = vector.multi_reduction <add>, %25, %cst [2] : vector<1x32x128xf32> to vector<1x32xf32>
      %cst_14 = arith.constant 9.765625E-4 : f32
      %27 = vector.broadcast %cst_14 : f32 to vector<1x32xf32>
      %28 = arith.mulf %26, %27 : vector<1x32xf32>
      %c0_15 = arith.constant 0 : index
      %c0_16 = arith.constant 0 : index
      %29 = vector.load %arg3[%c0_15, %c0_16] : memref<32x2xf32, #tpu.memory_space<vmem>>, vector<32x2xf32>
      %cst_17 = arith.constant dense<0.000000e+00> : vector<1x2xf32>
      %30 = tpu.matmul %28, %29, %cst_17 {dimension_numbers = #tpu.dot_dimension_numbers<[1], [0], [0], [1], [0, 0, 1, 1], [], []>} : vector<1x32xf32>, vector<32x2xf32>, vector<1x2xf32> -> vector<1x2xf32>
      %cst_18 = arith.constant 0.000000e+00 : f32
      %31 = vector.broadcast %cst_18 : f32 to vector<1x2xf32>
      %32 = arith.maximumf %30, %31 : vector<1x2xf32>
      %c0_19 = arith.constant 0 : index
      %c0_20 = arith.constant 0 : index
      %33 = vector.load %arg4[%c0_19, %c0_20] : memref<2x32xf32, #tpu.memory_space<vmem>>, vector<2x32xf32>
      %cst_21 = arith.constant dense<0.000000e+00> : vector<1x32xf32>
      %34 = tpu.matmul %32, %33, %cst_21 {dimension_numbers = #tpu.dot_dimension_numbers<[1], [0], [0], [1], [0, 0, 1, 1], [], []>} : vector<1x2xf32>, vector<2x32xf32>, vector<1x32xf32> -> vector<1x32xf32>
      %35 = arith.negf %34 : vector<1x32xf32>
      %36 = math.exp %35 : vector<1x32xf32>
      %cst_22 = arith.constant 1.000000e+00 : f32
      %37 = vector.broadcast %cst_22 : f32 to vector<1x32xf32>
      %38 = arith.addf %37, %36 : vector<1x32xf32>
      %39 = arith.divf %37, %38 : vector<1x32xf32>
      %40 = vector.shape_cast %39 : vector<1x32xf32> to vector<1x32x1xf32>
      %c0_23 = arith.constant 0 : index
      %c0_24 = arith.constant 0 : index
      %c0_25 = arith.constant 0 : index
      %41 = vector.load %arg5[%c0_23, %c0_24, %c0_25] : memref<1x32x1xf32, #tpu.memory_space<vmem>>, vector<1x32x1xf32>
      tpu.vector_store %arg5[%c0_23, %c0_24, %c0_25], %40 {strides = array<i32>} : memref<1x32x1xf32, #tpu.memory_space<vmem>>, vector<1x32x1xf32>,
    } else {
    }
    return
  }
  func.func @transform_0(%arg0: i32, %arg1: i32) -> (i32, i32, i32) {
    %c0_i32 = arith.constant 0 : i32
    %c0_i32_0 = arith.constant 0 : i32
    return %arg0, %c0_i32, %arg1 : i32, i32, i32
  }
  func.func @transform_1(%arg0: i32, %arg1: i32) -> (i32, i32) {
    %c0_i32 = arith.constant 0 : i32
    %c0_i32_0 = arith.constant 0 : i32
    %c0_i32_1 = arith.constant 0 : i32
    return %c0_i32, %c0_i32_0 : i32, i32
  }
  func.func @transform_2(%arg0: i32, %arg1: i32) -> (i32, i32) {
    %c0_i32 = arith.constant 0 : i32
    %c0_i32_0 = arith.constant 0 : i32
    %c0_i32_1 = arith.constant 0 : i32
    return %c0_i32, %c0_i32_0 : i32, i32
  }
  func.func @transform_3(%arg0: i32, %arg1: i32) -> (i32, i32, i32) {
    %c0_i32 = arith.constant 0 : i32
    %c0_i32_0 = arith.constant 0 : i32
    %c0_i32_1 = arith.constant 0 : i32
    return %arg0, %c0_i32, %c0_i32_0 : i32, i32, i32
  }
}

</mosaic_0001>

<bundles_post_ra>
// kernel: tpu_custom_call.1
= control target key start
LH: loop header
LB: loop body
LE: loop exit
PB: predicated region body
PF: predicated region fallthrough
CT: control target
= control target key end

     0   :  { %8 = vsyncpa [#allocation4], 0  ;;  %s958_s0 = inlined_call_operand.hbm [shape: f32[2,32,1024], index: 0, kind: input, shape index: {}]   ;;  %s959_s1 = inlined_call_operand.vmem [shape: f32[32,2], index: 1, kind: input, shape index: {}]   ;;  %s960_s2 = inlined_call_operand.vmem [shape: f32[2,32], index: 2, kind: input, shape index: {}]   ;;  %s961_s3 = inlined_call_operand.vmem [shape: f32[2,32,1], index: 3, kind: output, shape index: {}]  }
   0x1   :  { %10 = vsyncpa [#allocation4 + $0x1], 0  ;;  %s813_s12 = smov 0   ;;  %s815_s13 = smov 0  }
   0x2   :  { %s817_s14 = smov 0   ;;  %s819_s15 = smov 0  }
   0x3   :  { %s821_s16 = smov 0   ;;  %s823_s17 = smov 0  }
   0x4 LB: > { %s603_s18 = sadd.s32 4294967295, %s786_s17   ;;  %s28_s19 = sadd.s32 1, %s782_s16  ;;  %s786_s17 = sphi %s823_s17, %s16_s17   ;;  %s782_s16 = sphi %s821_s16, %s969_s16   ;;  %s778_s15 = sphi %s819_s15, %s968_s15   ;;  %s774_s14 = sphi %s817_s14, %s967_s14   ;;  %s770_s13 = sphi %s815_s13, %s966_s13   ;;  %s766_s12 = sphi %s813_s12, %s965_s12  }
   0x5   : > { %p30_p0 = scmp.ge.s32.totalorder %s28_s19, 2  ;;  %s37_s20 = sadd.s32 1, %s774_s14 }
   0x6   : > { %p44_p1 = scmp.ne.s32.totalorder %s774_s14, %s770_s13  ;;  %p45_p2 = scmp.eq.s32.totalorder %s786_s17, 0 }
   0x7   : > { %s971_s19 = smov (%p30_p0, %s28_s19), 0  ;;  %p50_p4 = scmp.ne.s32.totalorder %s770_s13, %s766_s12 }
   0x8   : > { %p849_p3 = por %p45_p2, %p44_p1  ;;  %s32_s22 = ssub.s32 %s782_s16, %s971_s19 }
   0x9   : > { %p51_p5 = scmp.eq.s32.totalorder %s603_s18, 0  ;;  %p35_p6 = scmp.eq.s32.totalorder %s32_s22, 0 }
   0xa   : > { %p651_p8 = scmp.lt.s32.totalorder %s786_s17, 2  ;;  %s148_s25 = sand.u32 1, %s774_s14  }
   0xb   : > { %p856_p7 = por %p51_p5, %p50_p4  ;;  %s620_s26 = sshll.u32 %s782_s16, 12 }
   0xc   : > { %s862_s24 = scalar_select %p35_p6, %s774_s14, %s37_s20  }
   0xd   : > { %s607_s27 = sshll.u32 %s148_s25, 8  ;;  %s160_s30 = scalar_lea.hbm %s958_s0, %s620_s26 }
   0xe   : > { %s152_s4 = scalar_lea.vmem [#allocation3], %s607_s27  ;;  %p871_p9 = pnand %p651_p8, %p849_p3 }
   0xf   : > { %s161_s5 = sshll.u32 %s152_s4, 4  ;;  %s149_s7 = scalar_lea.sflag [#allocation4], %s148_s25  ;;  %s162_s5 = int_to_ptr.vmem [resolvable:$true] %s161_s5 }
  0x10   : > { %p710_p10 = pneg %p871_p9  ;;  %s721_s8 = scalar_lea.vmem %s162_s5, 4096 }
  0x11   : > { %p722_p11 = scmp.ne.s32.totalorder %s162_s5, %s721_s8  ;;  %s788_s9 = smov [#allocation3]  }
  0x12   : > { %s726_s10 = sshll.u32 %s788_s9, 4  ;;  %s727_s10 = int_to_ptr.vmem [resolvable:$false] %s726_s10 }
  0x13   : > { %p724_p12 = pnand %p722_p11, %p710_p10  ;;  %s728_s11 = scalar_lea.vmem %s727_s10, 8192 }
  0x14   : > { %p729_p0 = scmp.lt.s32.totalorder %s162_s5, %s727_s10  ;;  %p730_p1 = scmp.lt.s32.totalorder %s728_s11, %s721_s8 }
  0x15   : > { %p725_p13 = pneg %p724_p12 }
  0x16   : > { %p731_p2 = por %p730_p1, %p729_p0 }
  0x18   : > { %p732_p3 = pnand %p731_p2, %p725_p13 }
  0x1a   : > { %735 = shalt.err (!%p732_p3)
}
  0x1b   : > { %s789_s12 = smov 1024   ;;  %s790_s18 = smov 64  }
  0x1c   : > { %650 = dma.hbm_to_vmem [thread:$0]  (!%p871_p9), %s160_s30, 4096, %s162_s5, %s149_s7, %s789_s12, %s789_s12, %s790_s18  }
  0x1d   : > { %p610_p4 = scmp.ge.s32.totalorder %s786_s17, 1  ;;  %p169_p5 = scmp.lt.s32.totalorder %s786_s17, 3 }
  0x1f   : > { %p170_p6 = pnand %p610_p4, %p169_p5 }
  0x20   : > { %s175_s20 = sand.u32 (!%p170_p6), 1, %s770_s13  }
  0x21   : > { %173 = sbr.rel (%p170_p6) target bundleno = 749 (0x2ed), region = 32  ;;  %s611_s21 = sshll.u32 (!%p170_p6), %s175_s20, 8 }
  0x22   : > { %s176_s22 = scalar_lea.sflag (!%p170_p6), [#allocation4], %s175_s20  ;;  %s882_s25 = scalar_lea.vmem (!%p170_p6), [#allocation3], %s611_s21 }
  0x26   : > { %761 = dma.done.wait (%p856_p7), %s176_s22, 4096  }
  0x27   : > { %763 = vsyncadd (%p856_p7), %s176_s22, 4294963200  ;;  %v216_v0 = vld [vmem:[%s882_s25] sm:$0xff]  ;;  %v217_v1 = vld [vmem:[%s882_s25 + $0x8] sm:$0xff]  ;;  %v791_v60 = vmov 0.0   ;;  %vm792_vm0 = vmmov 0   ;;  %vm326_vm1 = vcmask 130112  }
  0x28   : > { %v218_v2 = vld [vmem:[%s882_s25 + $0x10] sm:$0xff]  ;;  %v248_v3 = vadd.f32 %v217_v1, %v216_v0  ;;  %v219_v4 = vld [vmem:[%s882_s25 + $0x18] sm:$0xff]  ;;  %v232_v5 = vld [vmem:[%s882_s25 + $0x80] sm:$0xff]  ;;  %629 = vmatprep.subr.mxu0 %v791_v60  ;;  %640 = vmatprep.subr.mxu1 %v791_v60  ;;  %v315_v1 = vlaneseq  ;;  %vm333_vm2 = vcmask 195712   ;;  %vm340_vm3 = vcmask 261312   ;;  %p203_p7 = scmp.lt.s32.totalorder %s778_s15, 1 }
  0x29   : > { %v233_v7 = vld [vmem:[%s882_s25 + $0x88] sm:$0xff]  ;;  %v234_v8 = vld [vmem:[%s882_s25 + $0x90] sm:$0xff]  ;;  %v220_v9 = vld [vmem:[%s882_s25 + $0x20] sm:$0xff]  ;;  %637 = vmatprep.mubr.msk.f32.mxu0 %vm792_vm0, %v791_v60  ;;  %642 = vmatprep.mubr.msk.f32.mxu1 %vm792_vm0, %v791_v60  ;;  %vm342_vm4 = vcmask 261120   ;;  %vm421_vm5 = vcmask 1041408   ;;  %vm417_vm6 = vcmask 15360  }
  0x2a   : > { %v252_v6 = vadd.f32 %v248_v3, %v218_v2  ;;  %v250_v10 = vadd.f32 %v233_v7, %v232_v5  ;;  %v235_v12 = vld [vmem:[%s882_s25 + $0x98] sm:$0xff]  ;;  %v224_v13 = vld [vmem:[%s882_s25 + $0x40] sm:$0xff]  ;;  %v225_v14 = vld [vmem:[%s882_s25 + $0x48] sm:$0xff]  ;;  %v316_v2 = vand.u32 127, %v315_v1  ;;  %v318_v3 = vshrl.u32 %v315_v1, 7  ;;  %s973_s15 = smov (!%p203_p7, %s778_s15), 1 }
  0x2b   : > { %v221_v15 = vld [vmem:[%s882_s25 + $0x28] sm:$0xff]  ;;  %v226_v17 = vld [vmem:[%s882_s25 + $0x50] sm:$0xff]  ;;  %v249_v18 = vadd.f32 %v225_v14, %v224_v13  ;;  %v236_v21 = vld [vmem:[%s882_s25 + $0xa0] sm:$0xff]  ;;  %s621_s8 = sshll.u32 %s973_s15, 5  ;;  %vm520_vm7 = vcmask 7168  }
  0x2c   : > { %v256_v11 = vadd.f32 %v252_v6, %v219_v4  ;;  %v254_v16 = vadd.f32 %v250_v10, %v234_v8  ;;  %v222_v19 = vld [vmem:[%s882_s25 + $0x30] sm:$0xff]  ;;  %v227_v22 = vld [vmem:[%s882_s25 + $0x58] sm:$0xff]  ;;  %v240_v25 = vld [vmem:[%s882_s25 + $0xc0] sm:$0xff]  ;;  %v321_v5 = vadd.s32 4294967288, %v316_v2  ;;  %v328_v6 = vadd.s32 4294967280, %v316_v2  ;;  %s207_s11 = scalar_lea.vmem %s961_s3, %s621_s8 }
  0x2d   : > { %v253_v24 = vadd.f32 %v249_v18, %v226_v17  ;;  %v241_v26 = vld [vmem:[%s882_s25 + $0xc8] sm:$0xff]  ;;  %v242_v27 = vld [vmem:[%s882_s25 + $0xd0] sm:$0xff]  ;;  %v228_v30 = vld [vmem:[%s882_s25 + $0x60] sm:$0xff]  ;;  %v335_v8 = vadd.s32 4294967272, %v316_v2 }
  0x2e   : > { %v260_v20 = vadd.f32 %v256_v11, %v220_v9  ;;  %v258_v23 = vadd.f32 %v254_v16, %v235_v12  ;;  %v237_v29 = vld [vmem:[%s882_s25 + $0xa8] sm:$0xff]  ;;  %v251_v31 = vadd.f32 %v241_v26, %v240_v25  ;;  %v223_v32 = vld [vmem:[%s882_s25 + $0x38] sm:$0xff]  ;;  %v238_v37 = vld [vmem:[%s882_s25 + $0xb0] sm:$0xff]  ;;  %v319_v9 = vsub.s32 %v316_v2, %v318_v3 }
  0x2f   : > { %v257_v34 = vadd.f32 %v253_v24, %v227_v22  ;;  %v243_v35 = vld [vmem:[%s882_s25 + $0xd8] sm:$0xff]  ;;  %v229_v38 = vld [vmem:[%s882_s25 + $0x68] sm:$0xff]  ;;  %v244_v42 = vld [vmem:[%s882_s25 + $0xe0] sm:$0xff]  ;;  %v324_v11 = vsub.s32 %v321_v5, %v318_v3  ;;  %v331_v12 = vsub.s32 %v328_v6, %v318_v3  ;;  %v338_v16 = vsub.s32 %v335_v8, %v318_v3 }
  0x30   : > { %v264_v28 = vadd.f32 %v260_v20, %v221_v15  ;;  %v262_v33 = vadd.f32 %v258_v23, %v236_v21  ;;  %v255_v39 = vadd.f32 %v251_v31, %v242_v27  ;;  %v239_v44 = vld [vmem:[%s882_s25 + $0xb8] sm:$0xff]  ;;  %v230_v45 = vld [vmem:[%s882_s25 + $0x70] sm:$0xff]  ;;  %v245_v49 = vld [vmem:[%s882_s25 + $0xe8] sm:$0xff] }
  0x31   : > { %v261_v41 = vadd.f32 %v257_v34, %v228_v30  ;;  %v231_v50 = vld [vmem:[%s882_s25 + $0x78] sm:$0xff]  ;;  %v246_v54 = vld [vmem:[%s882_s25 + $0xf0] sm:$0xff]  ;;  %v308_v63 = vld [vmem:[%s959_s1 + $0x8] sm:$0xff] }
  0x32   : > { %v268_v36 = vadd.f32 %v264_v28, %v222_v19  ;;  %v266_v40 = vadd.f32 %v262_v33, %v237_v29  ;;  %v259_v46 = vadd.f32 %v255_v39, %v243_v35  ;;  %v247_v57 = vld [vmem:[%s882_s25 + $0xf8] sm:$0xff]  ;;  %v309_v62 = vld [vmem:[%s959_s1 + $0x10] sm:$0xff]  ;;  %v307_v0 = vld [vmem:[%s959_s1] sm:$0xff]  ;;  %v503_v35 = vsub.s32 0, %v318_v3 }
  0x33   : > { %v265_v48 = vadd.f32 %v261_v41, %v229_v38  ;;  %v310_v61 = vld [vmem:[%s959_s1 + $0x18] sm:$0xff]  ;;  %v416_v26 = vld [vmem:[%s960_s2] sm:$0x3] }
  0x34   : > { %v272_v43 = vadd.f32 %v268_v36, %v223_v32  ;;  %v270_v47 = vadd.f32 %v266_v40, %v238_v37  ;;  %v263_v51 = vadd.f32 %v259_v46, %v244_v42  ;;  %630 = vmatpush3.msra.mxu0 %v310_v61  ;;  %641 = vmatpush3.msk.msra.mxu1 %vm421_vm5, %v416_v26 }
  0x35   : > { %v269_v53 = vadd.f32 %v265_v48, %v230_v45  ;;  %631 = vmatprep.subr.mxu0 %v791_v60 }
  0x36   : > { %295 = vadd.xlane.f32.xlu0 %v272_v43  ;;  %v274_v52 = vadd.f32 %v270_v47, %v239_v44  ;;  %v267_v55 = vadd.f32 %v263_v51, %v245_v49  ;;  %632 = vmatpush3.msra.mxu0 %v309_v62 }
  0x37   : > { %v273_v56 = vadd.f32 %v269_v53, %v231_v50  ;;  %633 = vmatprep.subr.mxu0 %v791_v60 }
  0x38   : > { %299 = vadd.xlane.f32.xlu1 %v274_v52  ;;  %v271_v58 = vadd.f32 %v267_v55, %v246_v54  ;;  %634 = vmatpush3.msra.mxu0 %v308_v63 }
  0x39   : > { %635 = vmatprep.subr.mxu0 %v791_v60 }
  0x3a   : > { %297 = vadd.xlane.f32.xlu0 %v273_v56  ;;  %v275_v59 = vadd.f32 %v271_v58, %v247_v57  ;;  %636 = vmatpush3.msra.mxu0 %v307_v0 }
  0x3c   : > { %301 = vadd.xlane.f32.xlu1 %v275_v59 }
  0xbf   : > { %v296_v4 = vpop.xlane.xlu0 %295 }
  0xc0   : > { %v303_v10 = vmul.f32 0.0009765625, %v296_v4 }
  0xc1   : > { %v300_v7 = vpop.xlane.xlu1 %299 }
  0xc2   : > { %v305_v13 = vmul.f32 0.0009765625, %v300_v7  ;;  %v320_v17 = vrot.slane %v303_v10, %v319_v9 }
  0xc3   : > { %v298_v14 = vpop.xlane.xlu0 %297 }
  0xc4   : > { %v304_v15 = vmul.f32 0.0009765625, %v298_v14  ;;  %v332_v20 = vrot.slane %v305_v13, %v331_v12 }
  0xc5   : > { %v302_v19 = vpop.xlane.xlu1 %301 }
  0xc6   : > { %v325_v18 = vrot.slane %v304_v15, %v324_v11  ;;  %v306_v21 = vmul.f32 0.0009765625, %v302_v19 }
  0xc8   : > { %v327_v22 = vsel %vm326_vm1, %v325_v18, %v320_v17  ;;  %v339_v23 = vrot.slane %v306_v21, %v338_v16 }
  0xc9   : > { %v334_v24 = vsel %vm333_vm2, %v332_v20, %v327_v22 }
  0xca   : > { %v341_v25 = vsel %vm340_vm3, %v339_v23, %v334_v24 }
  0xcb   : > { %638 = vmatmul.mubr.msk.f32.vlgmr.msra.gmra.mxu0 %vm342_vm4, %v341_v25 }
 0x18b   : > { %v411_v27 = vpop.f32.mrf.mxu0 }
 0x18c   : > { %v415_v28 = vmax.f32 %v411_v27, 0.0 }
 0x18d   : > { %v639_v29 = vpop.f32.mrf.mxu0 }
 0x18e   : > { %643 = vmatmul.mubr.msk.f32.vlgmr.msra.gmra.mxu1 %vm417_vm6, %v415_v28 }
 0x24e   : > { %v491_v30 = vpop.f32.mrf.mxu1 }
 0x24f   : > { %v617_v31 = vmul.f32 -1.442695, %v491_v30 }
 0x250   : > { %v644_v32 = vpop.f32.mrf.mxu1 }
 0x251   : > { %704 = vpow2.f32 %v617_v31 }
 0x25e   : > { %v705_v33 = vpop.eup %704 }
 0x25f   : > { %v498_v34 = vadd.f32 1.0, %v705_v33 }
 0x261   : > { %706 = vrcp.f32 %v498_v34 }
 0x26e   : > { %v707_v36 = vpop.eup %706 }
 0x26f   : > { %v504_v37 = vrot.slane %v707_v36, %v503_v35 }
 0x271   : > { %510 = vbcast.lane.b32.xlu1 %v504_v37, 264  ;;  %506 = vbcast.lane.b32.xlu0 %v504_v37, 256 }
 0x275   : > { %514 = vbcast.lane.b32.xlu1 %v504_v37, 272 }
 0x279   : > { %518 = vbcast.lane.b32.xlu1 %v504_v37, 280 }
 0x2e3   : > { %v511_v38 = vpop.permute.xlu1 %510  ;;  %v507_v39 = vpop.permute.xlu0 %506 }
 0x2e4   : > { %522 = vst.msk [vmem:[%s207_s11 + $0x8] sm:$0xff] %vm520_vm7, %v511_v38  ;;  %521 = vst.msk [vmem:[%s207_s11] sm:$0xff] %vm520_vm7, %v507_v39 }
 0x2e7   : > { %v515_v40 = vpop.permute.xlu1 %514 }
 0x2e8   : > { %523 = vst.msk [vmem:[%s207_s11 + $0x10] sm:$0xff] %vm520_vm7, %v515_v40 }
 0x2eb   : > { %v519_v41 = vpop.permute.xlu1 %518 }
 0x2ec   : > { %524 = vst.msk [vmem:[%s207_s11 + $0x18] sm:$0xff] %vm520_vm7, %v519_v41 }
 0x2ed PF: > { %s16_s17 = sadd.s32 1, %s786_s17   ;;  %s965_s12 = smov %s770_s13 }
 0x2ee   : > { %p13_p8 = scmp.ge.s32.totalorder %s16_s17, 4   ;;  %s966_s13 = smov %s774_s14 }
 0x2ef   : > { %s967_s14 = smov %s862_s24  ;;  %s968_s15 = smov %s782_s16 }
 0x2f0   : > { %s969_s16 = smov %s971_s19  ;;  %15 = sbr.rel (!%p13_p8) target bundleno = 4 (0x4), region = 80 }
 0x2f5   :  { %546 = vsyncpa [#allocation4], 1 }
 0x2f6   :  { %548 = vsyncpa [#allocation4 + $0x1], 1 }

</bundles_post_ra>
